<compile_context>
chip_gen: v7x
topology: tpu7x:2x2x1
jax: 0.10.0
libtpu: 0.0.40
codegen_flags: <defaults>
</compile_context>

<pallas_src>
import functools

import jax
import jax.numpy as jnp
from jax.experimental import pallas as pl
from jax.experimental.pallas import tpu as pltpu

_LANE = 128
_MAX_TB = 24 * 1024   # caps scoped-VMEM use at ~40 MiB (see vmem_bytes below)


def _round_up(n, m):
    return ((n + m - 1) // m) * m


def _cdiv(a, b):
    return -(-a // b)


def _sigmoid(h):
    # Logistic via tanh: mathematically 1/(1+exp(-h)), but lowers to the EUP
    # (its own VLIW slot) instead of a VALU f32 divide.  Note: saturates to
    # exactly 0/1 slightly earlier in the far tails than the true logistic
    # (abs err < 1e-5; only matters if raw tail probabilities are consumed).
    return 0.5 * jnp.tanh(0.5 * h) + 0.5


def _mlp_kernel(x_ref, w1_ref, b1_ref, w2_ref, b2_ref, w3_ref, b3_ref, oT_ref):
    # x_ref: [TB, 20] batch-major block DMA'd straight from HBM (no wrapper
    # transpose).  One transpose on the XLU (idle slot here) makes every
    # activation lane-dense with the batch on the 128-wide lane axis.
    xT = jnp.transpose(x_ref[...], (1, 0))                                    # [20, TB]

    h1 = _sigmoid(jnp.dot(w1_ref[...], xT,
                          preferred_element_type=jnp.float32) + b1_ref[...])  # [10, TB]
    h2 = _sigmoid(jnp.dot(w2_ref[...], h1,
                          preferred_element_type=jnp.float32) + b2_ref[...])  # [10, TB]
    out = jnp.dot(w3_ref[...], h2,
                  preferred_element_type=jnp.float32) + b3_ref[...]           # [1, TB]

    oT_ref[...] = out.astype(oT_ref.dtype)   # lane-dense, unmasked stores


@functools.partial(jax.jit, static_argnames=("batch_tile",))
def mlp_forward(x, params, *, batch_tile=16384):
    """x: [batch, 20] float32. params: w1,b1,w2,b2,w3,b3 (PyTorch [out,in] / [out,1])."""
    B, F = x.shape
    assert F == 20, F
    w1, b1 = params["w1"], params["b1"]
    w2, b2 = params["w2"], params["b2"]
    w3, b3 = params["w3"], params["b3"]

    # --- Batch tiling --------------------------------------------------------
    # Big tiles amortize the ~0.35 us fixed per-grid-step cost (>= ~1 MB of x
    # per step), capped so the lane-padded [TB, 20] input double-buffer fits
    # the per-generation VMEM budget.  Keep the tile count even (>= 2) when the
    # batch allows so both v7x TensorCores get work.
    lanes = _round_up(B, _LANE)
    tb_req = max(_LANE, min(_round_up(batch_tile, _LANE), _MAX_TB, lanes))
    n_tiles = _cdiv(lanes, tb_req)
    if n_tiles == 1 and lanes >= 2 * _LANE:
        n_tiles = 2
    elif n_tiles > 1 and n_tiles % 2 == 1:
        n_tiles += 1
    tb = _round_up(_cdiv(lanes, n_tiles), _LANE)
    Bp = n_tiles * tb

    # Row padding only (no transpose): a no-op when B is already tile-aligned;
    # feed tile-aligned batches to avoid the extra copy entirely.
    x_p = jnp.pad(x, ((0, Bp - B), (0, 0))) if Bp != B else x

    def full(a):  # whole array, VMEM-resident across all batch tiles
        return pl.BlockSpec(a.shape, lambda i: (0, 0))
    # NOTE: default 2-deep buffering on these tiny constant-index blocks costs
    # only a few KiB; pl.Buffered(1) would be pure hygiene and is skipped.

    cost = pl.CostEstimate(
        flops=2 * Bp * (20 * 10 + 10 * 10 + 10 * 1),
        transcendentals=Bp * 20,
        bytes_accessed=Bp * (20 + 1) * 4
        + sum(a.size * 4 for a in (w1, b1, w2, b2, w3, b3)),
    )

    # Scoped-VMEM budget: x double-buffer is 2*128*4 B/row (20->128 lane
    # padding), lane-dense xT/h1/h2/out temporaries ~0.35 KB/row, plus weights
    # and compiler scratch.  Explicit because the default scoped limit is only
    # 16 MiB on v5e; _MAX_TB keeps this <= ~40 MiB, well under v7x's 64 MiB
    # physical VMEM.
    vmem_bytes = int(tb) * 1536 + (4 << 20)

    outT = pl.pallas_call(
        _mlp_kernel,
        out_shape=jax.ShapeDtypeStruct((1, Bp), jnp.float32),
        grid=(n_tiles,),
        in_specs=[
            pl.BlockSpec((tb, 20), lambda i: (i, 0)),   # x: pipelined over batch tiles
            full(w1), full(b1),
            full(w2), full(b2),
            full(w3), full(b3),
        ],
        out_specs=pl.BlockSpec((1, tb), lambda i: (0, i)),   # lane-dense output slab
        compiler_params=pltpu.CompilerParams(
            dimension_semantics=("parallel",),          # megacore sharding on v7x
            vmem_limit_bytes=vmem_bytes,
        ),
        cost_estimate=cost,
    )(x_p, w1, b1, w2, b2, w3, b3)

    return outT[0, :B].reshape(B, 1)


def init_params(key):
    """nn.Linear-style init: uniform(+/- 1/sqrt(fan_in)); weights [out,in], biases [out,1]."""
    def linear(key, fan_in, fan_out):
        kw, kb = jax.random.split(key)
        bound = 1.0 / jnp.sqrt(fan_in)
        w = jax.random.uniform(kw, (fan_out, fan_in), jnp.float32, -bound, bound)
        b = jax.random.uniform(kb, (fan_out, 1), jnp.float32, -bound, bound)
        return w, b

    k1, k2, k3 = jax.random.split(key, 3)
    w1, b1 = linear(k1, 20, 10)
    w2, b2 = linear(k2, 10, 10)
    w3, b3 = linear(k3, 10, 1)
    return {"w1": w1, "b1": b1, "w2": w2, "b2": b2, "w3": w3, "b3": b3}


def mlp_reference(x, params):
    h1 = jax.nn.sigmoid(x @ params["w1"].T + params["b1"][:, 0])
    h2 = jax.nn.sigmoid(h1 @ params["w2"].T + params["b2"][:, 0])
    return h2 @ params["w3"].T + params["b3"][:, 0]


if __name__ == "__main__":
    key = jax.random.PRNGKey(0)
    kx, kp = jax.random.split(key)

    batch = 8
    x = jax.random.normal(kx, (batch, 20), jnp.float32)
    params = init_params(kp)

    out = mlp_forward(x, params)
    out = jax.block_until_ready(out)

    ref = mlp_reference(x, params)
    assert out.shape == (batch, 1), out.shape
    assert jnp.allclose(out, ref, atol=1e-5, rtol=1e-5), (out, ref)

    print("KERNEL_OK")
</pallas_src>

<mosaic_0001>
module attributes {stable_mosaic.version = 11 : i64} {
  func.func @_mlp_kernel(%arg0: i32, %arg1: memref<128x20xf32, #tpu.memory_space<vmem>>, %arg2: memref<10x20xf32, #tpu.memory_space<vmem>>, %arg3: memref<10x1xf32, #tpu.memory_space<vmem>>, %arg4: memref<10x10xf32, #tpu.memory_space<vmem>>, %arg5: memref<10x1xf32, #tpu.memory_space<vmem>>, %arg6: memref<1x10xf32, #tpu.memory_space<vmem>>, %arg7: memref<1x1xf32, #tpu.memory_space<vmem>>, %arg8: memref<1x128xf32, #tpu.memory_space<vmem>>) attributes {dimension_semantics = [#tpu.dimension_semantics<parallel>], iteration_bounds = array<i64: 1>, scalar_prefetch = 0 : i64, scratch_operands = 0 : i64, tpu.core_type = #tpu.core_type<tc>, window_params = [{transform_indices = @transform_0, window_bounds = array<i64: 128, 20>}, {pipeline_mode = #tpu.pipeline_mode<synchronous>, transform_indices = @transform_1, window_bounds = array<i64: 10, 20>}, {pipeline_mode = #tpu.pipeline_mode<synchronous>, transform_indices = @transform_2, window_bounds = array<i64: 10, 1>}, {pipeline_mode = #tpu.pipeline_mode<synchronous>, transform_indices = @transform_3, window_bounds = array<i64: 10, 10>}, {pipeline_mode = #tpu.pipeline_mode<synchronous>, transform_indices = @transform_4, window_bounds = array<i64: 10, 1>}, {pipeline_mode = #tpu.pipeline_mode<synchronous>, transform_indices = @transform_5, window_bounds = array<i64: 1, 10>}, {pipeline_mode = #tpu.pipeline_mode<synchronous>, transform_indices = @transform_6, window_bounds = array<i64: 1, 1>}, {transform_indices = @transform_7, window_bounds = array<i64: 1, 128>}]} {
    %c0 = arith.constant 0 : index
    %c0_0 = arith.constant 0 : index
    %0 = vector.load %arg1[%c0, %c0_0] : memref<128x20xf32, #tpu.memory_space<vmem>>, vector<128x20xf32>
    %1 = tpu.transpose %0, [1, 0] : vector<128x20xf32> -> vector<20x128xf32>
    %c0_1 = arith.constant 0 : index
    %c0_2 = arith.constant 0 : index
    %2 = vector.load %arg2[%c0_1, %c0_2] : memref<10x20xf32, #tpu.memory_space<vmem>>, vector<10x20xf32>
    %cst = arith.constant dense<0.000000e+00> : vector<10x128xf32>
    %3 = tpu.matmul %2, %1, %cst {dimension_numbers = #tpu.dot_dimension_numbers<[1], [0], [0], [1], [0, 0, 1, 1], [], []>} : vector<10x20xf32>, vector<20x128xf32>, vector<10x128xf32> -> vector<10x128xf32>
    %c0_3 = arith.constant 0 : index
    %c0_4 = arith.constant 0 : index
    %4 = vector.load %arg3[%c0_3, %c0_4] : memref<10x1xf32, #tpu.memory_space<vmem>>, vector<10x1xf32>
    %5 = vector.broadcast %4 : vector<10x1xf32> to vector<10x128xf32>
    %6 = arith.addf %3, %5 : vector<10x128xf32>
    %cst_5 = arith.constant 5.000000e-01 : f32
    %7 = vector.broadcast %cst_5 : f32 to vector<10x128xf32>
    %8 = arith.mulf %7, %6 : vector<10x128xf32>
    %9 = math.tanh %8 : vector<10x128xf32>
    %cst_6 = arith.constant 5.000000e-01 : f32
    %10 = vector.broadcast %cst_6 : f32 to vector<10x128xf32>
    %11 = arith.mulf %10, %9 : vector<10x128xf32>
    %cst_7 = arith.constant 5.000000e-01 : f32
    %12 = vector.broadcast %cst_7 : f32 to vector<10x128xf32>
    %13 = arith.addf %11, %12 : vector<10x128xf32>
    %c0_8 = arith.constant 0 : index
    %c0_9 = arith.constant 0 : index
    %14 = vector.load %arg4[%c0_8, %c0_9] : memref<10x10xf32, #tpu.memory_space<vmem>>, vector<10x10xf32>
    %cst_10 = arith.constant dense<0.000000e+00> : vector<10x128xf32>
    %15 = tpu.matmul %14, %13, %cst_10 {dimension_numbers = #tpu.dot_dimension_numbers<[1], [0], [0], [1], [0, 0, 1, 1], [], []>} : vector<10x10xf32>, vector<10x128xf32>, vector<10x128xf32> -> vector<10x128xf32>
    %c0_11 = arith.constant 0 : index
    %c0_12 = arith.constant 0 : index
    %16 = vector.load %arg5[%c0_11, %c0_12] : memref<10x1xf32, #tpu.memory_space<vmem>>, vector<10x1xf32>
    %17 = vector.broadcast %16 : vector<10x1xf32> to vector<10x128xf32>
    %18 = arith.addf %15, %17 : vector<10x128xf32>
    %cst_13 = arith.constant 5.000000e-01 : f32
    %19 = vector.broadcast %cst_13 : f32 to vector<10x128xf32>
    %20 = arith.mulf %19, %18 : vector<10x128xf32>
    %21 = math.tanh %20 : vector<10x128xf32>
    %cst_14 = arith.constant 5.000000e-01 : f32
    %22 = vector.broadcast %cst_14 : f32 to vector<10x128xf32>
    %23 = arith.mulf %22, %21 : vector<10x128xf32>
    %cst_15 = arith.constant 5.000000e-01 : f32
    %24 = vector.broadcast %cst_15 : f32 to vector<10x128xf32>
    %25 = arith.addf %23, %24 : vector<10x128xf32>
    %c0_16 = arith.constant 0 : index
    %c0_17 = arith.constant 0 : index
    %26 = vector.load %arg6[%c0_16, %c0_17] : memref<1x10xf32, #tpu.memory_space<vmem>>, vector<1x10xf32>
    %cst_18 = arith.constant dense<0.000000e+00> : vector<1x128xf32>
    %27 = tpu.matmul %26, %25, %cst_18 {dimension_numbers = #tpu.dot_dimension_numbers<[1], [0], [0], [1], [0, 0, 1, 1], [], []>} : vector<1x10xf32>, vector<10x128xf32>, vector<1x128xf32> -> vector<1x128xf32>
    %c0_19 = arith.constant 0 : index
    %c0_20 = arith.constant 0 : index
    %28 = vector.load %arg7[%c0_19, %c0_20] : memref<1x1xf32, #tpu.memory_space<vmem>>, vector<1x1xf32>
    %29 = vector.broadcast %28 : vector<1x1xf32> to vector<1x128xf32>
    %30 = arith.addf %27, %29 : vector<1x128xf32>
    %c0_21 = arith.constant 0 : index
    %c0_22 = arith.constant 0 : index
    %31 = vector.load %arg8[%c0_21, %c0_22] : memref<1x128xf32, #tpu.memory_space<vmem>>, vector<1x128xf32>
    tpu.vector_store %arg8[%c0_21, %c0_22], %30 {strides = array<i32>} : memref<1x128xf32, #tpu.memory_space<vmem>>, vector<1x128xf32>,
    return
  }
  func.func @transform_0(%arg0: i32) -> (i32, i32) {
    %c0_i32 = arith.constant 0 : i32
    %c0_i32_0 = arith.constant 0 : i32
    return %arg0, %c0_i32 : i32, i32
  }
  func.func @transform_1(%arg0: i32) -> (i32, i32) {
    %c0_i32 = arith.constant 0 : i32
    %c0_i32_0 = arith.constant 0 : i32
    %c0_i32_1 = arith.constant 0 : i32
    return %c0_i32, %c0_i32_0 : i32, i32
  }
  func.func @transform_2(%arg0: i32) -> (i32, i32) {
    %c0_i32 = arith.constant 0 : i32
    %c0_i32_0 = arith.constant 0 : i32
    %c0_i32_1 = arith.constant 0 : i32
    return %c0_i32, %c0_i32_0 : i32, i32
  }
  func.func @transform_3(%arg0: i32) -> (i32, i32) {
    %c0_i32 = arith.constant 0 : i32
    %c0_i32_0 = arith.constant 0 : i32
    %c0_i32_1 = arith.constant 0 : i32
    return %c0_i32, %c0_i32_0 : i32, i32
  }
  func.func @transform_4(%arg0: i32) -> (i32, i32) {
    %c0_i32 = arith.constant 0 : i32
    %c0_i32_0 = arith.constant 0 : i32
    %c0_i32_1 = arith.constant 0 : i32
    return %c0_i32, %c0_i32_0 : i32, i32
  }
  func.func @transform_5(%arg0: i32) -> (i32, i32) {
    %c0_i32 = arith.constant 0 : i32
    %c0_i32_0 = arith.constant 0 : i32
    %c0_i32_1 = arith.constant 0 : i32
    return %c0_i32, %c0_i32_0 : i32, i32
  }
  func.func @transform_6(%arg0: i32) -> (i32, i32) {
    %c0_i32 = arith.constant 0 : i32
    %c0_i32_0 = arith.constant 0 : i32
    %c0_i32_1 = arith.constant 0 : i32
    return %c0_i32, %c0_i32_0 : i32, i32
  }
  func.func @transform_7(%arg0: i32) -> (i32, i32) {
    %c0_i32 = arith.constant 0 : i32
    %c0_i32_0 = arith.constant 0 : i32
    return %c0_i32, %arg0 : i32, i32
  }
}

</mosaic_0001>

<bundles_post_ra>
// kernel: mlp_forward.1
= control target key start
LH: loop header
LB: loop body
LE: loop exit
PB: predicated region body
PF: predicated region fallthrough
CT: control target
= control target key end

     0   :  { %vm58_vm0 = vcmask 162816   ;;  %v566_v3 = vmov 0   ;;  %vm210_vm2 = vcmask 80896   ;;  %vm217_vm3 = vcmask 1041408   ;;  %s745_s0 = inlined_call_operand.vmem [shape: f32[128,20], index: 0, kind: input, shape index: {}]   ;;  %s746_s6 = inlined_call_operand.<no memory space> [shape: f32[1,1], index: 6, kind: input, shape index: {}]   ;;  %s747_s1 = inlined_call_operand.vmem [shape: f32[10,20], index: 1, kind: input, shape index: {}]   ;;  %s748_s2 = inlined_call_operand.vmem [shape: f32[10,1], index: 2, kind: input, shape index: {}]   ;;  %s749_s3 = inlined_call_operand.vmem [shape: f32[10,10], index: 3, kind: input, shape index: {}]   ;;  %s750_s4 = inlined_call_operand.vmem [shape: f32[10,1], index: 4, kind: input, shape index: {}]   ;;  %s751_s5 = inlined_call_operand.vmem [shape: f32[1,10], index: 5, kind: input, shape index: {}]   ;;  %s752_s7 = inlined_call_operand.vmem [shape: f32[1,128], index: 7, kind: output, shape index: {}]  }
   0x1   :  { %v28_v0 = vld [vmem:[%s745_s0] sm:$0xff]  ;;  %v29_v1 = vld [vmem:[%s745_s0 + $0x8] sm:$0xff]  ;;  %vm619_vm1 = vmpackc.low %vm58_vm0, %vm58_vm0  ;;  %556 = vset.pattern.permute.xlu0 %v566_v3  ;;  %v12_v4 = vstv %s746_s6  ;;  %557 = vset.pattern.permute.xlu1 %v566_v3  ;;  %vm567_vm4 = vmmov 1   ;;  %v568_v52 = vmov 0.0|0.0   ;;  %vm569_vm6 = vmmov 0  }
   0x2   :  { %v493_v5 = vpack.c.bf16 %v29_v1, %v28_v0  ;;  %v30_v6 = vld [vmem:[%s745_s0 + $0x10] sm:$0xff]  ;;  %v31_v7 = vld [vmem:[%s745_s0 + $0x18] sm:$0xff]  ;;  %13 = vst [vmem:[#allocation2] sm:$0x1] %v12_v4  ;;  %v44_v9 = vld [vmem:[%s747_s1] sm:$0xff]  ;;  %v570_v53 = vmov 0.0  }
   0x3   :  { %v499_v8 = vpack.c.bf16 %v31_v7, %v30_v6  ;;  %v32_v10 = vld [vmem:[%s745_s0 + $0x20] sm:$0xff]  ;;  %v33_v11 = vld [vmem:[%s745_s0 + $0x28] sm:$0xff]  ;;  %476 = vmatprep.mubr.msk.f32.mxu0 %vm58_vm0, %v44_v9  ;;  %v34_v16 = vld [vmem:[%s745_s0 + $0x30] sm:$0xff]  ;;  %v311_v6 = vlaneseq }
   0x4   :  { %495 = vmatprep.subr.msk.bf16.mxu0 %vm619_vm1, %v493_v5  ;;  %v46_v12 = vld [vmem:[%s748_s2] sm:$0xff]  ;;  %v47_v13 = vld [vmem:[%s748_s2 + $0x8] sm:$0x3]  ;;  %v505_v14 = vpack.c.bf16 %v33_v11, %v32_v10  ;;  %v35_v17 = vld [vmem:[%s745_s0 + $0x38] sm:$0xff] }
   0x5   :  { %498 = vmatpush3.bf16.xpose.msk.msra.mxu0 %vm619_vm1, %v493_v5  ;;  %50 = vperm.xlu0 %556, %v46_v12   ;;  %v511_v18 = vpack.c.bf16 %v35_v17, %v34_v16  ;;  %v36_v19 = vld [vmem:[%s745_s0 + $0x40] sm:$0xff]  ;;  %v37_v20 = vld [vmem:[%s745_s0 + $0x48] sm:$0xff]  ;;  %v38_v22 = vld [vmem:[%s745_s0 + $0x50] sm:$0xff]  ;;  %v312_v7 = vshrl.u32 %v311_v6, 7 }
   0x6   :  { %501 = vmatprep.subr.msk.bf16.mxu0 %vm619_vm1, %v499_v8  ;;  %v517_v21 = vpack.c.bf16 %v37_v20, %v36_v19  ;;  %v39_v23 = vld [vmem:[%s745_s0 + $0x58] sm:$0xff]  ;;  %v40_v25 = vld [vmem:[%s745_s0 + $0x60] sm:$0xff]  ;;  %v41_v26 = vld [vmem:[%s745_s0 + $0x68] sm:$0xff] }
   0x7   :  { %v523_v24 = vpack.c.bf16 %v39_v23, %v38_v22  ;;  %v529_v27 = vpack.c.bf16 %v41_v26, %v40_v25  ;;  %v42_v28 = vld [vmem:[%s745_s0 + $0x70] sm:$0xff]  ;;  %v43_v29 = vld [vmem:[%s745_s0 + $0x78] sm:$0xff]  ;;  %v45_v31 = vld [vmem:[%s747_s1 + $0x8] sm:$0x3] }
   0x8   :  { %v535_v30 = vpack.c.bf16 %v43_v29, %v42_v28  ;;  %v196_v32 = vld [vmem:[%s749_s3] sm:$0xff]  ;;  %v199_v34 = vld [vmem:[%s750_s4 + $0x8] sm:$0x3]  ;;  %vm724_vm5 = vmpackc.low %vm217_vm3, %vm567_vm4 }
   0x9   :  { %55 = vperm.xlu0 %556, %v47_v13   ;;  %v305_v15 = vld [vmem:[#allocation2] sm:$0x1]  ;;  %483 = vmatprep.mubr.msk.f32.mxu1 %vm210_vm2, %v196_v32  ;;  %v197_v51 = vld [vmem:[%s749_s3 + $0x8] sm:$0x3] }
   0xa   :  { %v198_v33 = vld [vmem:[%s750_s4] sm:$0xff] }
   0xb   :  { %202 = vperm.xlu1 %557, %v198_v33   ;;  %v304_v5 = vld [vmem:[%s751_s5] sm:$0x1] }
   0xd   :  { %504 = vmatpush3.bf16.xpose.msk.msra.mxu0 %vm619_vm1, %v499_v8  ;;  %308 = vperm.xlu0 %556, %v305_v15   ;;  %v313_v8 = vsub.s32 0, %v312_v7 }
   0xe   :  { %507 = vmatprep.subr.msk.bf16.mxu0 %vm619_vm1, %v505_v14 }
   0xf   :  { %207 = vperm.xlu1 %557, %v199_v34  }
  0x15   :  { %510 = vmatpush3.bf16.xpose.msk.msra.mxu0 %vm619_vm1, %v505_v14 }
  0x16   :  { %513 = vmatprep.subr.msk.bf16.mxu0 %vm619_vm1, %v511_v18 }
  0x1d   :  { %516 = vmatpush3.bf16.xpose.msk.msra.mxu0 %vm619_vm1, %v511_v18 }
  0x1e   :  { %519 = vmatprep.subr.msk.bf16.mxu0 %vm619_vm1, %v517_v21 }
  0x25   :  { %522 = vmatpush3.bf16.xpose.msk.msra.mxu0 %vm619_vm1, %v517_v21 }
  0x26   :  { %525 = vmatprep.subr.msk.bf16.mxu0 %vm619_vm1, %v523_v24 }
  0x2d   :  { %528 = vmatpush3.bf16.xpose.msk.msra.mxu0 %vm619_vm1, %v523_v24 }
  0x2e   :  { %531 = vmatprep.subr.msk.bf16.mxu0 %vm619_vm1, %v529_v27 }
  0x35   :  { %534 = vmatpush3.bf16.xpose.msk.msra.mxu0 %vm619_vm1, %v529_v27 }
  0x36   :  { %537 = vmatprep.subr.msk.bf16.mxu0 %vm619_vm1, %v535_v30 }
  0x3d   :  { %540 = vmatpush3.bf16.xpose.msk.msra.mxu0 %vm619_vm1, %v535_v30 }
  0x44   :  { %477 = vmatmul.mubr.msk.f32.vlgmr.msra.gmra.mrb[0].mxu0 %vm58_vm0, %v45_v31 }
  0x84   :  { %v51_v35 = vpop.permute.xlu0 %50 }
  0x88   :  { %v56_v36 = vpop.permute.xlu0 %55 }
  0x8a   :  { %v203_v54 = vpop.permute.xlu1 %202 }
  0x8c   :  { %v309_v9 = vpop.permute.xlu0 %308 }
  0x8d   :  { %v314_v10 = vrot.slane %v309_v9, %v313_v8 }
  0x8e   :  { %v208_v55 = vpop.permute.xlu1 %207 }
 0x117   :  { %v478_v37 = vpop.f32.mrb[0].mxu0 }
 0x118   :  { %v185_v38 = vadd.f32 %v478_v37, %v56_v36  ;;  %v179_v39 = vpop.f32.mrb[1].mxu0 }
 0x119   :  { %v180_v40 = vadd.f32 %v179_v39, %v51_v35 }
 0x11a   :  { %v189_v41 = vmul.f32 0.5, %v185_v38 }
 0x11b   :  { %v188_v42 = vmul.f32 0.5, %v180_v40 }
 0x11c   :  { %558 = vtanh.f32 %v189_v41 }
 0x11d   :  { %560 = vtanh.f32 %v188_v42 }
 0x126   :  { %v559_v43 = vpop.eup %558 }
 0x127   :  { %v561_v44 = vpop.eup %560  ;;  %v193_v45 = vmul.f32 0.5, %v559_v43 }
 0x128   :  { %v192_v46 = vmul.f32 0.5, %v561_v44 }
 0x129   :  { %v195_v47 = vadd.f32 0.5, %v193_v45 }
 0x12a   :  { %v194_v48 = vadd.f32 0.5, %v192_v46 }
 0x12c   :  { %v541_v50 = vpack.c.bf16 %v195_v47, %v194_v48 }
 0x12e   :  { %543 = vmatprep.subr.msk.bf16.mxu1 %vm724_vm5, %v541_v50 }
 0x12f   :  { %546 = vmatpush3.bf16.msk.msra.mxu1 %vm724_vm5, %v541_v50 }
 0x130   :  { %547 = vmatprep.subr.bf16.mxu1 %v568_v52 }
 0x132   :  { %484 = vmatmul.mubr.msk.f32.vlgmr.msra.gmra.mrb[0].mxu1 %vm210_vm2, %v197_v51 }
 0x133   :  { %490 = vmatprep.mubr.msk.f32.mxu1 %vm569_vm6, %v570_v53 }
 0x205   :  { %v485_v56 = vpop.f32.mrb[0].mxu1 }
 0x206   :  { %v293_v57 = vadd.f32 %v485_v56, %v208_v55  ;;  %v287_v58 = vpop.f32.mrb[1].mxu1 }
 0x207   :  { %v288_v59 = vadd.f32 %v287_v58, %v203_v54 }
 0x208   :  { %v297_v60 = vmul.f32 0.5, %v293_v57 }
 0x209   :  { %v296_v61 = vmul.f32 0.5, %v288_v59 }
 0x20a   :  { %562 = vtanh.f32 %v297_v60 }
 0x20b   :  { %564 = vtanh.f32 %v296_v61 }
 0x214   :  { %v563_v62 = vpop.eup %562 }
 0x215   :  { %v565_v63 = vpop.eup %564  ;;  %v301_v0 = vmul.f32 0.5, %v563_v62 }
 0x216   :  { %v300_v1 = vmul.f32 0.5, %v565_v63 }
 0x217   :  { %v303_v2 = vadd.f32 0.5, %v301_v0 }
 0x218   :  { %v302_v3 = vadd.f32 0.5, %v300_v1 }
 0x21a   :  { %v548_v4 = vpack.c.bf16 %v303_v2, %v302_v3 }
 0x21c   :  { %550 = vmatpush3.bf16.msk.msra.mxu1 %vm724_vm5, %v548_v4 }
 0x21f   :  { %491 = vmatmul.mubr.msk.f32.vlgmr.msra.gmra.mrb[2].mxu1 %vm210_vm2, %v304_v5 }
 0x2f2   :  { %v387_v11 = vpop.f32.mrb[2].mxu1 }
 0x2f3   :  { %v388_v12 = vadd.f32 %v387_v11, %v314_v10  ;;  %v492_v13 = vpop.f32.mrb[3].mxu1 }
 0x2f5   :  { %391 = vst [vmem:[%s752_s7] sm:$0x1] %v388_v12 }

</bundles_post_ra>
